<compile_context>
chip_gen: v5e
topology: v5e:2x2
jax: 0.10.0
libtpu: 0.0.40
codegen_flags: <defaults>
</compile_context>

<pallas_src>
import functools

import jax
import jax.numpy as jnp
from jax.experimental import pallas as pl
from jax.experimental.pallas import tpu as pltpu  # noqa: F401  (TPU backend)


# ------------------------- Fused layer kernel ------------------------------ #
def _fused_layer_kernel(p_ref, w_ref, b_ref, g_ref, beta_ref, o_ref, *,
                        count, eps):
    # p_ref:    (4, K, P) im2col patches, corner-major: corner c = dh*2+dw holds
    #           the patches whose conv output lands at pool-window pos (dh, dw).
    #           K = KH*KW*Cin (sublanes), P = N*PH*PW (lanes, spatial).
    # w_ref:    (Cout, K)   flattened conv weights (channels on sublanes)
    # b_ref:    (Cout, 1)   conv bias
    # g_ref:    (Cout, 1)   BN gamma
    # beta_ref: (Cout, 1)   BN beta
    # o_ref:    (Cout, P)   pooled / normalized / ReLU'd output
    w = w_ref[...]
    b = b_ref[...]
    cout = w.shape[0]

    ys = []
    s = jnp.zeros((cout, 1), jnp.float32)
    ss = jnp.zeros((cout, 1), jnp.float32)
    # Conv (+bias+ReLU): one small MXU matmul per pool-window corner, output in
    # channels-on-sublane / spatial-on-lane (lane-dense) layout.
    for c in range(4):
        acc = jnp.dot(w, p_ref[c], preferred_element_type=jnp.float32) + b
        y = jnp.maximum(acc, 0.0)                       # ReLU
        ys.append(y)
        # Single-pass training-mode BatchNorm statistics (per-channel).
        s = s + jnp.sum(y, axis=1, keepdims=True)
        ss = ss + jnp.sum(y * y, axis=1, keepdims=True)

    inv_count = 1.0 / count
    mean = s * inv_count
    var = jnp.maximum(ss * inv_count - mean * mean, 0.0)   # biased variance
    inv = jax.lax.rsqrt(var + eps)
    scale = g_ref[...] * inv
    shift = beta_ref[...] - mean * scale

    # MaxPool2d(2) first, BN affine after:
    #   max(a*y+b) == a*max(y)+b  for a >= 0,  a*min(y)+b  for a < 0.
    pmax = jnp.maximum(jnp.maximum(ys[0], ys[1]), jnp.maximum(ys[2], ys[3]))
    pmin = jnp.minimum(jnp.minimum(ys[0], ys[1]), jnp.minimum(ys[2], ys[3]))
    z = scale * jnp.where(scale >= 0.0, pmax, pmin) + shift
    o_ref[...] = jnp.maximum(z, 0.0).astype(o_ref.dtype)   # final ReLU


# --------------------------------- Wrapper --------------------------------- #
def layer_forward(x_nchw, w_oihw, bias, gamma, beta, *, kernel_pool=2, eps=1e-5):
    N, Cin, H, W = x_nchw.shape
    Cout, _, KH, KW = w_oihw.shape
    OH, OW = H - KH + 1, W - KW + 1        # Conv2d(..., stride=1), padding=0
    K = KH * KW * Cin

    # TODO(synk): only kernel_pool=2 with even conv-output dims is implemented
    # (module defaults); odd trailing rows/cols (dropped by MaxPool2d) are not
    # handled. For much larger N/H/W, split into a gridded stats+apply pair.
    assert kernel_pool == 2 and OH % 2 == 0 and OW % 2 == 0
    PH, PW = OH // 2, OW // 2
    P = N * PH * PW

    # ---------------- wrapper-side layout glue (no compute) ----------------
    # patches[c, k, p]  with  c=(dh,dw), k=(kh,kw,cin), p=(n,ph,pw)
    #                 == x[n, cin, 2*ph+dh+kh, 2*pw+dw+kw]
    x_t = jnp.transpose(x_nchw, (1, 0, 2, 3))                    # (Cin,N,H,W)
    sl = jnp.stack([x_t[:, :, kh:kh + OH, kw:kw + OW]
                    for kh in range(KH) for kw in range(KW)], axis=0)
    sl = sl.reshape(KH * KW, Cin, N, PH, 2, PW, 2)
    patches = jnp.transpose(sl, (4, 6, 0, 1, 2, 3, 5)).reshape(4, K, P)

    wmat = jnp.transpose(w_oihw, (0, 2, 3, 1)).reshape(Cout, K)  # k=(kh,kw,cin)
    bcol = bias.reshape(Cout, 1)
    gcol = gamma.reshape(Cout, 1)
    betacol = beta.reshape(Cout, 1)

    out = pl.pallas_call(
        functools.partial(_fused_layer_kernel,
                          count=float(N * OH * OW), eps=eps),
        out_shape=jax.ShapeDtypeStruct((Cout, P), x_nchw.dtype),
    )(patches, wmat, bcol, gcol, betacol)

    # (Cout, N*PH*PW) -> (N, Cout, PH, PW)   (glue)
    return jnp.transpose(out.reshape(Cout, N, PH, PW), (1, 0, 2, 3))


# ------------------------- Pure-JAX reference (check) ---------------------- #
def layer_reference(x, w, b, gamma, beta, eps=1e-5):
    y = jax.lax.conv_general_dilated(
        x, w, window_strides=(1, 1), padding="VALID",
        dimension_numbers=("NCHW", "OIHW", "NCHW"))
    y = y + b[None, :, None, None]
    y = jnp.maximum(y, 0.0)
    mean = jnp.mean(y, axis=(0, 2, 3), keepdims=True)
    var = jnp.mean((y - mean) ** 2, axis=(0, 2, 3), keepdims=True)
    y = (y - mean) * jax.lax.rsqrt(var + eps)
    y = y * gamma[None, :, None, None] + beta[None, :, None, None]
    y = jax.lax.reduce_window(y, -jnp.inf, jax.lax.max,
                              (1, 1, 2, 2), (1, 1, 2, 2), "VALID")
    return jnp.maximum(y, 0.0)


if __name__ == "__main__":
    # Module config: in_feature=4, output_feature=8, kernel_conv=3, pool=2, stride=1
    N, Cin, Cout, H, W, Kc = 2, 4, 8, 16, 16, 3

    key = jax.random.PRNGKey(0)
    kx, kw, kb = jax.random.split(key, 3)
    x = jax.random.normal(kx, (N, Cin, H, W), dtype=jnp.float32)          # NCHW
    w = 0.1 * jax.random.normal(kw, (Cout, Cin, Kc, Kc), dtype=jnp.float32)
    b = 0.1 * jax.random.normal(kb, (Cout,), dtype=jnp.float32)
    gamma = jnp.ones((Cout,), dtype=jnp.float32)    # BatchNorm2d default init
    beta = jnp.zeros((Cout,), dtype=jnp.float32)

    out = jax.jit(layer_forward)(x, w, b, gamma, beta)
    out = jax.block_until_ready(out)

    ref = layer_reference(x, w, b, gamma, beta)
    assert out.shape == ref.shape == (N, Cout, (H - Kc + 1) // 2, (W - Kc + 1) // 2)
    assert jnp.allclose(out, ref, atol=2e-3, rtol=2e-3), "mismatch vs reference"

    print("KERNEL_OK")
</pallas_src>

<mosaic_0001>
module attributes {stable_mosaic.version = 11 : i64} {
  func.func @_fused_layer_kernel(%arg0: memref<4x36x98xf32, #tpu.memory_space<vmem>>, %arg1: memref<8x36xf32, #tpu.memory_space<vmem>>, %arg2: memref<8x1xf32, #tpu.memory_space<vmem>>, %arg3: memref<8x1xf32, #tpu.memory_space<vmem>>, %arg4: memref<8x1xf32, #tpu.memory_space<vmem>>, %arg5: memref<8x98xf32, #tpu.memory_space<vmem>>) attributes {dimension_semantics = [], scalar_prefetch = 0 : i64, scratch_operands = 0 : i64, tpu.core_type = #tpu.core_type<tc>} {
    %c0 = arith.constant 0 : index
    %c0_0 = arith.constant 0 : index
    %0 = vector.load %arg1[%c0, %c0_0] : memref<8x36xf32, #tpu.memory_space<vmem>>, vector<8x36xf32>
    %c0_1 = arith.constant 0 : index
    %c0_2 = arith.constant 0 : index
    %1 = vector.load %arg2[%c0_1, %c0_2] : memref<8x1xf32, #tpu.memory_space<vmem>>, vector<8x1xf32>
    %cst = arith.constant 0.000000e+00 : f32
    %2 = vector.broadcast %cst : f32 to vector<8x1xf32>
    %cst_3 = arith.constant 0.000000e+00 : f32
    %3 = vector.broadcast %cst_3 : f32 to vector<8x1xf32>
    %c0_4 = arith.constant 0 : index
    %c0_5 = arith.constant 0 : index
    %c0_6 = arith.constant 0 : index
    %4 = vector.load %arg0[%c0_4, %c0_5, %c0_6] : memref<4x36x98xf32, #tpu.memory_space<vmem>>, vector<1x36x98xf32>
    %5 = vector.shape_cast %4 : vector<1x36x98xf32> to vector<36x98xf32>
    %cst_7 = arith.constant dense<0.000000e+00> : vector<8x98xf32>
    %6 = tpu.matmul %0, %5, %cst_7 {dimension_numbers = #tpu.dot_dimension_numbers<[1], [0], [0], [1], [0, 0, 1, 1], [], []>} : vector<8x36xf32>, vector<36x98xf32>, vector<8x98xf32> -> vector<8x98xf32>
    %7 = vector.broadcast %1 : vector<8x1xf32> to vector<8x98xf32>
    %8 = arith.addf %6, %7 : vector<8x98xf32>
    %cst_8 = arith.constant 0.000000e+00 : f32
    %9 = vector.broadcast %cst_8 : f32 to vector<8x98xf32>
    %10 = arith.maximumf %8, %9 : vector<8x98xf32>
    %cst_9 = arith.constant dense<0.000000e+00> : vector<8xf32>
    %11 = vector.multi_reduction <add>, %10, %cst_9 [1] : vector<8x98xf32> to vector<8xf32>
    %12 = vector.shape_cast %11 : vector<8xf32> to vector<8x1xf32>
    %13 = arith.addf %2, %12 : vector<8x1xf32>
    %14 = arith.mulf %10, %10 : vector<8x98xf32>
    %cst_10 = arith.constant dense<0.000000e+00> : vector<8xf32>
    %15 = vector.multi_reduction <add>, %14, %cst_10 [1] : vector<8x98xf32> to vector<8xf32>
    %16 = vector.shape_cast %15 : vector<8xf32> to vector<8x1xf32>
    %17 = arith.addf %3, %16 : vector<8x1xf32>
    %c1 = arith.constant 1 : index
    %c0_11 = arith.constant 0 : index
    %c0_12 = arith.constant 0 : index
    %18 = vector.load %arg0[%c1, %c0_11, %c0_12] : memref<4x36x98xf32, #tpu.memory_space<vmem>>, vector<1x36x98xf32>
    %19 = vector.shape_cast %18 : vector<1x36x98xf32> to vector<36x98xf32>
    %cst_13 = arith.constant dense<0.000000e+00> : vector<8x98xf32>
    %20 = tpu.matmul %0, %19, %cst_13 {dimension_numbers = #tpu.dot_dimension_numbers<[1], [0], [0], [1], [0, 0, 1, 1], [], []>} : vector<8x36xf32>, vector<36x98xf32>, vector<8x98xf32> -> vector<8x98xf32>
    %21 = vector.broadcast %1 : vector<8x1xf32> to vector<8x98xf32>
    %22 = arith.addf %20, %21 : vector<8x98xf32>
    %cst_14 = arith.constant 0.000000e+00 : f32
    %23 = vector.broadcast %cst_14 : f32 to vector<8x98xf32>
    %24 = arith.maximumf %22, %23 : vector<8x98xf32>
    %cst_15 = arith.constant dense<0.000000e+00> : vector<8xf32>
    %25 = vector.multi_reduction <add>, %24, %cst_15 [1] : vector<8x98xf32> to vector<8xf32>
    %26 = vector.shape_cast %25 : vector<8xf32> to vector<8x1xf32>
    %27 = arith.addf %13, %26 : vector<8x1xf32>
    %28 = arith.mulf %24, %24 : vector<8x98xf32>
    %cst_16 = arith.constant dense<0.000000e+00> : vector<8xf32>
    %29 = vector.multi_reduction <add>, %28, %cst_16 [1] : vector<8x98xf32> to vector<8xf32>
    %30 = vector.shape_cast %29 : vector<8xf32> to vector<8x1xf32>
    %31 = arith.addf %17, %30 : vector<8x1xf32>
    %c2 = arith.constant 2 : index
    %c0_17 = arith.constant 0 : index
    %c0_18 = arith.constant 0 : index
    %32 = vector.load %arg0[%c2, %c0_17, %c0_18] : memref<4x36x98xf32, #tpu.memory_space<vmem>>, vector<1x36x98xf32>
    %33 = vector.shape_cast %32 : vector<1x36x98xf32> to vector<36x98xf32>
    %cst_19 = arith.constant dense<0.000000e+00> : vector<8x98xf32>
    %34 = tpu.matmul %0, %33, %cst_19 {dimension_numbers = #tpu.dot_dimension_numbers<[1], [0], [0], [1], [0, 0, 1, 1], [], []>} : vector<8x36xf32>, vector<36x98xf32>, vector<8x98xf32> -> vector<8x98xf32>
    %35 = vector.broadcast %1 : vector<8x1xf32> to vector<8x98xf32>
    %36 = arith.addf %34, %35 : vector<8x98xf32>
    %cst_20 = arith.constant 0.000000e+00 : f32
    %37 = vector.broadcast %cst_20 : f32 to vector<8x98xf32>
    %38 = arith.maximumf %36, %37 : vector<8x98xf32>
    %cst_21 = arith.constant dense<0.000000e+00> : vector<8xf32>
    %39 = vector.multi_reduction <add>, %38, %cst_21 [1] : vector<8x98xf32> to vector<8xf32>
    %40 = vector.shape_cast %39 : vector<8xf32> to vector<8x1xf32>
    %41 = arith.addf %27, %40 : vector<8x1xf32>
    %42 = arith.mulf %38, %38 : vector<8x98xf32>
    %cst_22 = arith.constant dense<0.000000e+00> : vector<8xf32>
    %43 = vector.multi_reduction <add>, %42, %cst_22 [1] : vector<8x98xf32> to vector<8xf32>
    %44 = vector.shape_cast %43 : vector<8xf32> to vector<8x1xf32>
    %45 = arith.addf %31, %44 : vector<8x1xf32>
    %c3 = arith.constant 3 : index
    %c0_23 = arith.constant 0 : index
    %c0_24 = arith.constant 0 : index
    %46 = vector.load %arg0[%c3, %c0_23, %c0_24] : memref<4x36x98xf32, #tpu.memory_space<vmem>>, vector<1x36x98xf32>
    %47 = vector.shape_cast %46 : vector<1x36x98xf32> to vector<36x98xf32>
    %cst_25 = arith.constant dense<0.000000e+00> : vector<8x98xf32>
    %48 = tpu.matmul %0, %47, %cst_25 {dimension_numbers = #tpu.dot_dimension_numbers<[1], [0], [0], [1], [0, 0, 1, 1], [], []>} : vector<8x36xf32>, vector<36x98xf32>, vector<8x98xf32> -> vector<8x98xf32>
    %49 = vector.broadcast %1 : vector<8x1xf32> to vector<8x98xf32>
    %50 = arith.addf %48, %49 : vector<8x98xf32>
    %cst_26 = arith.constant 0.000000e+00 : f32
    %51 = vector.broadcast %cst_26 : f32 to vector<8x98xf32>
    %52 = arith.maximumf %50, %51 : vector<8x98xf32>
    %cst_27 = arith.constant dense<0.000000e+00> : vector<8xf32>
    %53 = vector.multi_reduction <add>, %52, %cst_27 [1] : vector<8x98xf32> to vector<8xf32>
    %54 = vector.shape_cast %53 : vector<8xf32> to vector<8x1xf32>
    %55 = arith.addf %41, %54 : vector<8x1xf32>
    %56 = arith.mulf %52, %52 : vector<8x98xf32>
    %cst_28 = arith.constant dense<0.000000e+00> : vector<8xf32>
    %57 = vector.multi_reduction <add>, %56, %cst_28 [1] : vector<8x98xf32> to vector<8xf32>
    %58 = vector.shape_cast %57 : vector<8xf32> to vector<8x1xf32>
    %59 = arith.addf %45, %58 : vector<8x1xf32>
    %cst_29 = arith.constant 0.00255102036 : f32
    %60 = vector.broadcast %cst_29 : f32 to vector<8x1xf32>
    %61 = arith.mulf %55, %60 : vector<8x1xf32>
    %cst_30 = arith.constant 0.00255102036 : f32
    %62 = vector.broadcast %cst_30 : f32 to vector<8x1xf32>
    %63 = arith.mulf %59, %62 : vector<8x1xf32>
    %64 = arith.mulf %61, %61 : vector<8x1xf32>
    %65 = arith.subf %63, %64 : vector<8x1xf32>
    %cst_31 = arith.constant 0.000000e+00 : f32
    %66 = vector.broadcast %cst_31 : f32 to vector<8x1xf32>
    %67 = arith.maximumf %65, %66 : vector<8x1xf32>
    %cst_32 = arith.constant 9.99999974E-6 : f32
    %68 = vector.broadcast %cst_32 : f32 to vector<8x1xf32>
    %69 = arith.addf %67, %68 : vector<8x1xf32>
    %70 = math.rsqrt %69 : vector<8x1xf32>
    %c0_33 = arith.constant 0 : index
    %c0_34 = arith.constant 0 : index
    %71 = vector.load %arg3[%c0_33, %c0_34] : memref<8x1xf32, #tpu.memory_space<vmem>>, vector<8x1xf32>
    %72 = arith.mulf %71, %70 : vector<8x1xf32>
    %c0_35 = arith.constant 0 : index
    %c0_36 = arith.constant 0 : index
    %73 = vector.load %arg4[%c0_35, %c0_36] : memref<8x1xf32, #tpu.memory_space<vmem>>, vector<8x1xf32>
    %74 = arith.mulf %61, %72 : vector<8x1xf32>
    %75 = arith.subf %73, %74 : vector<8x1xf32>
    %76 = arith.maximumf %10, %24 : vector<8x98xf32>
    %77 = arith.maximumf %38, %52 : vector<8x98xf32>
    %78 = arith.maximumf %76, %77 : vector<8x98xf32>
    %79 = arith.minimumf %10, %24 : vector<8x98xf32>
    %80 = arith.minimumf %38, %52 : vector<8x98xf32>
    %81 = arith.minimumf %79, %80 : vector<8x98xf32>
    %cst_37 = arith.constant 0.000000e+00 : f32
    %82 = vector.broadcast %cst_37 : f32 to vector<8x1xf32>
    %83 = arith.cmpf oge, %72, %82 : vector<8x1xf32>
    %84 = vector.shape_cast %83 : vector<8x1xi1> to vector<8x1xi1>
    %85 = vector.broadcast %84 : vector<8x1xi1> to vector<8x98xi1>
    %86 = arith.select %85, %78, %81 : vector<8x98xi1>, vector<8x98xf32>
    %87 = vector.broadcast %72 : vector<8x1xf32> to vector<8x98xf32>
    %88 = arith.mulf %87, %86 : vector<8x98xf32>
    %89 = vector.broadcast %75 : vector<8x1xf32> to vector<8x98xf32>
    %90 = arith.addf %88, %89 : vector<8x98xf32>
    %cst_38 = arith.constant 0.000000e+00 : f32
    %91 = vector.broadcast %cst_38 : f32 to vector<8x98xf32>
    %92 = arith.maximumf %90, %91 : vector<8x98xf32>
    %c0_39 = arith.constant 0 : index
    %c0_40 = arith.constant 0 : index
    %93 = vector.load %arg5[%c0_39, %c0_40] : memref<8x98xf32, #tpu.memory_space<vmem>>, vector<8x98xf32>
    tpu.vector_store %arg5[%c0_39, %c0_40], %92 {strides = array<i32>} : memref<8x98xf32, #tpu.memory_space<vmem>>, vector<8x98xf32>,
    return
  }
}

</mosaic_0001>

<bundles_post_ra>
// kernel: layer_forward.1
= control target key start
LH: loop header
LB: loop body
LE: loop exit
PB: predicated region body
PF: predicated region fallthrough
CT: control target
= control target key end

     0   :  { %vm36_vm0 = vcmask 1043456   ;;  %v269_v3 = vmov 0   ;;  %vm32_vm1 = vcmask 293888   ;;  %vm61_vm2 = vcmask 801792   ;;  %s388_s0 = inlined_call_operand.vmem [shape: f32[4,36,98], index: 0, kind: input, shape index: {}]   ;;  %s389_s1 = inlined_call_operand.vmem [shape: f32[8,36], index: 1, kind: input, shape index: {}]   ;;  %s390_s2 = inlined_call_operand.vmem [shape: f32[8,1], index: 2, kind: input, shape index: {}]   ;;  %s391_s3 = inlined_call_operand.vmem [shape: f32[8,1], index: 3, kind: input, shape index: {}]   ;;  %s392_s4 = inlined_call_operand.vmem [shape: f32[8,1], index: 4, kind: input, shape index: {}]   ;;  %s393_s5 = inlined_call_operand.vmem [shape: f32[8,98], index: 5, kind: output, shape index: {}]  }
   0x1   :  { %v26_v0 = vld [vmem:[%s388_s0 + $0x20] sm:$0xf]  ;;  %v246_v1 = vld [vmem:[%s388_s0 + $0x48] sm:$0xf]  ;;  %v253_v2 = vld [vmem:[%s388_s0 + $0x70] sm:$0xf]  ;;  %264 = vset.pattern.permute.xlu0 %v269_v3  ;;  %266 = vset.pattern.permute.xlu1 %v269_v3 }
   0x2   :  { %240 = vmatpush.msk.msra.mxu0 %vm36_vm0, %v26_v0  ;;  %247 = vmatpush.msk.msra.mxu1 %vm36_vm0, %v246_v1  ;;  %v260_v4 = vld [vmem:[%s388_s0 + $0x98] sm:$0xf]  ;;  %v245_v6 = vld [vmem:[%s388_s0 + $0x40] sm:$0xff]  ;;  %v252_v7 = vld [vmem:[%s388_s0 + $0x68] sm:$0xff] }
   0x3   :  { %v25_v5 = vld [vmem:[%s388_s0 + $0x18] sm:$0xff]  ;;  %254 = vmatpush.msk.msra.mxu2 %vm36_vm0, %v253_v2  ;;  %261 = vmatpush.msk.msra.mxu3 %vm36_vm0, %v260_v4  ;;  %v259_v8 = vld [vmem:[%s388_s0 + $0x90] sm:$0xff]  ;;  %v251_v11 = vld [vmem:[%s388_s0 + $0x60] sm:$0xff] }
   0x4   :  { %v24_v9 = vld [vmem:[%s388_s0 + $0x10] sm:$0xff]  ;;  %52 = vmatpush.msra.mxu0 %v25_v5  ;;  %92 = vmatpush.msra.mxu1 %v245_v6  ;;  %v244_v10 = vld [vmem:[%s388_s0 + $0x38] sm:$0xff]  ;;  %v258_v12 = vld [vmem:[%s388_s0 + $0x88] sm:$0xff] }
   0x5   :  { %131 = vmatpush.msra.mxu2 %v252_v7  ;;  %170 = vmatpush.msra.mxu3 %v259_v8  ;;  %v23_v13 = vld [vmem:[%s388_s0 + $0x8] sm:$0xff]  ;;  %v243_v14 = vld [vmem:[%s388_s0 + $0x30] sm:$0xff]  ;;  %v250_v15 = vld [vmem:[%s388_s0 + $0x58] sm:$0xff] }
   0x6   :  { %53 = vmatpush.msra.mxu0 %v24_v9  ;;  %93 = vmatpush.msra.mxu1 %v244_v10  ;;  %v257_v16 = vld [vmem:[%s388_s0 + $0x80] sm:$0xff]  ;;  %v242_v18 = vld [vmem:[%s388_s0 + $0x28] sm:$0xff]  ;;  %v249_v19 = vld [vmem:[%s388_s0 + $0x50] sm:$0xff] }
   0x7   :  { %132 = vmatpush.msra.mxu2 %v251_v11  ;;  %171 = vmatpush.msra.mxu3 %v258_v12  ;;  %v22_v17 = vld [vmem:[%s388_s0] sm:$0xff]  ;;  %v256_v20 = vld [vmem:[%s388_s0 + $0x78] sm:$0xff] }
   0x8   :  { %54 = vmatpush.msra.mxu0 %v23_v13  ;;  %94 = vmatpush.msra.mxu1 %v243_v14  ;;  %v20_v21 = vld [vmem:[%s389_s1] sm:$0xff] }
   0x9   :  { %133 = vmatpush.msra.mxu2 %v250_v15  ;;  %172 = vmatpush.msra.mxu3 %v257_v16  ;;  %v21_v22 = vld [vmem:[%s390_s2] sm:$0xff] }
   0xa   :  { %55 = vmatpush.msra.mxu0 %v22_v17  ;;  %95 = vmatpush.msra.mxu1 %v242_v18  ;;  %v204_v17 = vld [vmem:[%s391_s3] sm:$0xff] }
   0xb   :  { %134 = vmatpush.msra.mxu2 %v249_v19  ;;  %173 = vmatpush.msra.mxu3 %v256_v20 }
   0xc   :  { %241 = vmatmul.msk.f32.vlgmr.msra.gmra.mxu0 %vm32_vm1, %v20_v21  ;;  %248 = vmatmul.msk.f32.vlgmr.msra.gmra.mxu1 %vm32_vm1, %v20_v21 }
   0xd   :  { %255 = vmatmul.msk.f32.vlgmr.msra.gmra.mxu2 %vm32_vm1, %v20_v21  ;;  %262 = vmatmul.msk.f32.vlgmr.msra.gmra.mxu3 %vm32_vm1, %v20_v21 }
   0xe   :  { %29 = vperm.xlu0 %264, %v21_v22   ;;  %265 = vset.pattern.permute.xlu2 %v269_v3  ;;  %v206_v22 = vld [vmem:[%s392_s4] sm:$0xff] }
  0x80   :  { %v30_v23 = vpop.permute.xlu0 %29 }
  0x89   :  { %v57_v24 = vpop.f32.mrf.mxu0  ;;  %v97_v25 = vpop.f32.mrf.mxu1 }
  0x8a   :  { %v58_v26 = vadd.f32 %v57_v24, %v30_v23  ;;  %v98_v27 = vadd.f32 %v97_v25, %v30_v23 }
  0x8c   :  { %v60_v28 = vmax.f32 %v58_v26, 0.0  ;;  %v100_v29 = vmax.f32 %v98_v27, 0.0 }
  0x8e   :  { %v101_v30 = vsel %vm61_vm2, %v100_v29, 0.0  ;;  %v62_v31 = vsel %vm61_vm2, %v60_v28, 0.0  ;;  %v105_v32 = vmul.f32 %v100_v29, %v100_v29  ;;  %v209_v33 = vmax.f32 %v60_v28, %v100_v29 }
  0x8f   :  { %102 = vadd.xlane.f32.xlu1 %v101_v30  ;;  %63 = vadd.xlane.f32.xlu0 %v62_v31  ;;  %v212_v34 = vmin.f32 %v60_v28, %v100_v29  ;;  %v66_v40 = vmul.f32 %v60_v28, %v60_v28 }
  0x90   :  { %v136_v35 = vpop.f32.mrf.mxu2  ;;  %v175_v36 = vpop.f32.mrf.mxu3  ;;  %v106_v37 = vsel %vm61_vm2, %v105_v32, 0.0 }
  0x91   :  { %v137_v38 = vadd.f32 %v136_v35, %v30_v23  ;;  %v176_v39 = vadd.f32 %v175_v36, %v30_v23  ;;  %107 = vadd.xlane.f32.xlu2 %v106_v37  ;;  %v67_v43 = vsel %vm61_vm2, %v66_v40, 0.0 }
  0x93   :  { %v139_v41 = vmax.f32 %v137_v38, 0.0  ;;  %v178_v42 = vmax.f32 %v176_v39, 0.0 }
  0x95   :  { %v210_v44 = vmax.f32 %v139_v41, %v178_v42  ;;  %v213_v45 = vmin.f32 %v139_v41, %v178_v42  ;;  %v140_v46 = vsel %vm61_vm2, %v139_v41, 0.0  ;;  %v144_v49 = vmul.f32 %v139_v41, %v139_v41 }
  0x96   :  { %v179_v51 = vsel %vm61_vm2, %v178_v42, 0.0  ;;  %v183_v52 = vmul.f32 %v178_v42, %v178_v42 }
  0x97   :  { %68 = vadd.xlane.f32.xlu1 %v67_v43  ;;  %v211_v47 = vmax.f32 %v209_v33, %v210_v44  ;;  %v214_v48 = vmin.f32 %v212_v34, %v213_v45  ;;  %v145_v50 = vsel %vm61_vm2, %v144_v49, 0.0 }
  0x98   :  { %v184_v53 = vsel %vm61_vm2, %v183_v52, 0.0 }
  0x99   :  { %141 = vadd.xlane.f32.xlu2 %v140_v46 }
  0x9f   :  { %146 = vadd.xlane.f32.xlu1 %v145_v50 }
  0xa1   :  { %180 = vadd.xlane.f32.xlu2 %v179_v51 }
  0xa7   :  { %185 = vadd.xlane.f32.xlu1 %v184_v53 }
 0x102   :  { %v103_v54 = vpop.xlane.xlu1 %102  ;;  %v64_v58 = vpop.xlane.xlu0 %63 }
 0x103   :  { %v104_v59 = vadd.f32 %v103_v54, %v64_v58 }
 0x104   :  { %v108_v55 = vpop.xlane.xlu2 %107 }
 0x10a   :  { %v69_v56 = vpop.xlane.xlu1 %68 }
 0x10b   :  { %v109_v0 = vadd.f32 %v108_v55, %v69_v56 }
 0x10c   :  { %v142_v57 = vpop.xlane.xlu2 %141 }
 0x10d   :  { %v143_v61 = vadd.f32 %v142_v57, %v104_v59 }
 0x112   :  { %v147_v60 = vpop.xlane.xlu1 %146 }
 0x113   :  { %v148_v1 = vadd.f32 %v147_v60, %v109_v0 }
 0x114   :  { %v181_v62 = vpop.xlane.xlu2 %180 }
 0x115   :  { %v182_v63 = vadd.f32 %v181_v62, %v143_v61 }
 0x117   :  { %v188_v2 = vmul.f32 0.0025510204, %v182_v63 }
 0x119   :  { %v190_v6 = vmul.f32 %v188_v2, %v188_v2 }
 0x11a   :  { %v186_v4 = vpop.xlane.xlu1 %185 }
 0x11b   :  { %v187_v5 = vadd.f32 %v186_v4, %v148_v1 }
 0x11d   :  { %v189_v7 = vmul.f32 0.0025510204, %v187_v5 }
 0x11f   :  { %v191_v8 = vsub.f32 %v189_v7, %v190_v6 }
 0x121   :  { %v192_v9 = vmax.f32 %v191_v8, 0.0 }
 0x123   :  { %v193_v10 = vadd.f32 1e-05, %v192_v9 }
 0x125   :  { %267 = vrsqrt.f32 %v193_v10  ;;  %vm200_vm4 = vweird.f32 %v193_v10 }
 0x12b   :  { %v268_v11 = vpop.eup %267 }
 0x12c   :  { %v195_v12 = vmul.f32 %v268_v11, %v193_v10  ;;  %vm201_vm3 = vweird.f32 %v268_v11 }
 0x12d   :  { %vm202_vm5 = vmor %vm200_vm4, %vm201_vm3 }
 0x12e   :  { %v196_v13 = vmul.f32 %v268_v11, %v195_v12 }
 0x130   :  { %v197_v14 = vmul.f32 0.5, %v196_v13 }
 0x132   :  { %v198_v15 = vsub.f32 1.5, %v197_v14 }
 0x134   :  { %v199_v16 = vmul.f32 %v268_v11, %v198_v15 }
 0x136   :  { %v203_v18 = vsel %vm202_vm5, %v268_v11, %v199_v16 }
 0x137   :  { %v205_v19 = vmul.f32 %v204_v17, %v203_v18 }
 0x139   :  { %224 = vperm.xlu1 %266, %v205_v19   ;;  %vm215_vm6 = vcmp.ge.f32.partialorder %v205_v19, 0.0  ;;  %v207_v21 = vmul.f32 %v205_v19, %v188_v2 }
 0x13a   :  { %v216_v20 = vsel %vm215_vm6, 1, %v269_v3 }
 0x13b   :  { %218 = vperm.xlu2 %265, %v216_v20   ;;  %v208_v23 = vsub.f32 %v206_v22, %v207_v21 }
 0x143   :  { %230 = vperm.xlu2 %265, %v208_v23  }
 0x195   :  { %v219_v24 = vpop.permute.xlu2 %218 }
 0x196   :  { %vm220_vm7 = vcmp.eq.s32.totalorder %v219_v24, 1 }
 0x197   :  { %v221_v25 = vsel %vm220_vm7, %v211_v47, %v214_v48 }
 0x19d   :  { %v231_v28 = vpop.permute.xlu2 %230 }
 0x1ab   :  { %v225_v26 = vpop.permute.xlu1 %224 }
 0x1ac   :  { %v227_v27 = vmul.f32 %v225_v26, %v221_v25 }
 0x1ae   :  { %v233_v29 = vadd.f32 %v231_v28, %v227_v27 }
 0x1b0   :  { %v234_v30 = vmax.f32 %v233_v29, 0.0 }
 0x1b2   :  { %235 = vst.msk [vmem:[%s393_s5] sm:$0xff] %vm61_vm2, %v234_v30 }

</bundles_post_ra>
